<compile_context>
chip_gen: v7x
topology: tpu7x:2x2x1
jax: 0.10.0
libtpu: 0.0.40
codegen_flags: <defaults>
</compile_context>

<pallas_src>
import functools

import jax
import jax.numpy as jnp
from jax.experimental import pallas as pl
from jax.experimental.pallas import tpu as pltpu


# ----------------------------------------------------------------------------
# Static comparator networks (evaluated in Python at trace time).
# ----------------------------------------------------------------------------
def _batcher_sorting_network(n):
    """Batcher merge-exchange sorting network (Knuth 5.2.2 Alg. M), any n."""
    comps = []
    if n < 2:
        return comps
    t = (n - 1).bit_length()          # ceil(log2(n))
    p = 1 << (t - 1)
    while p > 0:
        q = 1 << (t - 1)
        r = 0
        d = p
        while True:
            for i in range(n - d):
                if (i & p) == r:
                    comps.append((i, i + d))
            if q == p:
                break
            d = q - p
            q >>= 1
            r = p
        p >>= 1
    return comps


def _median_selection_network(n):
    """Prune the sorting network so only the median rank(s) are guaranteed."""
    comps = _batcher_sorting_network(n)
    needed = {n // 2} if n % 2 == 1 else {n // 2 - 1, n // 2}
    kept = []
    for (i, j) in reversed(comps):
        if i in needed or j in needed:
            kept.append((i, j))
            needed.add(i)
            needed.add(j)
    kept.reverse()
    return tuple(kept)


# ----------------------------------------------------------------------------
# Kernel
# ----------------------------------------------------------------------------
def _pp_loss_kernel(wc_ref, yp_ref, yt_ref, ae_ref, se_ref, sf_ref, *,
                    n_adjs, comparators, inv_feat):
    # wc_ref : SMEM (n_adjs+1,)   folded sf weights [w_0..w_{A-1}, c]
    # yp_ref : VMEM (n_adjs, TB, FT)  predictions (native dtype)
    # yt_ref : VMEM (TB, FT)          targets
    # ae_ref : VMEM (TB, FT)          |median - y_true|
    # se_ref : VMEM (TB, 1)           per-batch SE mean (accumulated over f tiles)
    # sf_ref : VMEM (TB, 1)           per-batch sf term (accumulated over f tiles)
    A = n_adjs
    f = pl.program_id(1)

    y = yp_ref[...].astype(jnp.float32)        # (A, TB, FT)
    yt = yt_ref[...].astype(jnp.float32)       # (TB, FT)

    # Single pass over adjacency rows: plain sum + ll-weighted sum (folded sf).
    rows = [y[a] for a in range(A)]
    sum_y = rows[0]
    acc = rows[0] * wc_ref[0]
    for a in range(1, A):
        sum_y = sum_y + rows[a]
        acc = acc + rows[a] * wc_ref[a]

    # Median over n_adjs via pruned Batcher selection network (VPU min/max).
    srt = list(rows)
    for i, j in comparators:
        lo = jnp.minimum(srt[i], srt[j])
        hi = jnp.maximum(srt[i], srt[j])
        srt[i], srt[j] = lo, hi
    if A % 2 == 1:
        med = srt[A // 2]
    else:
        med = 0.5 * (srt[A // 2 - 1] + srt[A // 2])
    ae_ref[...] = jnp.abs(med - yt).astype(ae_ref.dtype)

    mean_y = sum_y * (1.0 / A)
    diff = mean_y - yt                                     # (TB, FT)
    sf_loss = acc - sum_y * wc_ref[A]                      # folded LOO baseline

    se_part = jnp.sum(diff * diff, axis=-1, keepdims=True) * inv_feat        # (TB,1)
    sf_part = jnp.sum(sf_loss * (2.0 * diff), axis=-1, keepdims=True) * inv_feat

    @pl.when(f == 0)
    def _():
        se_ref[...] = jnp.zeros_like(se_ref)
        sf_ref[...] = jnp.zeros_like(sf_ref)

    se_ref[...] += se_part
    sf_ref[...] += sf_part


# ----------------------------------------------------------------------------
# Wrapper
# ----------------------------------------------------------------------------
def _choose_tiles(bs, n_adjs, n_feat, tile_f=None):
    # Batch tile: sublane-dense (8) when the batch is big enough.
    tb = 8 if bs >= 8 else bs
    # Feature tile: keep the n_adjs live (tb, ft) f32 rows under ~48 vregs
    # (~192 KiB) so the selection network does not spill.
    budget = (192 * 1024) // (max(n_adjs, 1) * max(tb, 1) * 4)
    max_ft = max(128, (budget // 128) * 128)
    if tile_f is not None:
        ft = tile_f if tile_f >= n_feat else max(128, (tile_f // 128) * 128)
    else:
        ft = n_feat if n_feat <= max_ft else max_ft
    if ft >= n_feat:
        ft = n_feat
    return tb, ft


def point_prediction_loss(y_pred, y_true, log_likelihoods, *,
                          gradient_estimator="sf", variance_reduction=True,
                          tile_f=None):
    bs, n_adjs, n_nodes, out_feat = y_pred.shape
    A = n_adjs
    F = n_nodes * out_feat

    use_vr = variance_reduction and gradient_estimator == "sf"
    if use_vr and A < 2:
        raise ValueError("variance_reduction requires n_adjs >= 2")

    # Folded score-function weights (tiny, host-side).
    ll = jnp.sum(log_likelihoods, axis=-1).astype(jnp.float32)        # (A,)
    if use_vr:
        w = ll / (A - 1)
        c = jnp.sum(ll) / (A * (A - 1))
    else:
        w = ll / A
        c = jnp.zeros((), jnp.float32)
    wc = jnp.concatenate([w, c[None]])                                # (A+1,)

    # Layout: (A, bs, F) so each adjacency slice is a sublane-dense tile.
    # Keep native dtype (the kernel upcasts to f32 internally).
    yp = jnp.transpose(y_pred.reshape(bs, A, F), (1, 0, 2))
    yt = y_true.reshape(bs, F)

    tb, ft = _choose_tiles(bs, A, F, tile_f)
    nb = pl.cdiv(bs, tb)
    nf = pl.cdiv(F, ft)
    bs_p, F_p = nb * tb, nf * ft
    if bs_p != bs or F_p != F:
        # Zero padding is exact: padded lanes/rows contribute 0 to the sums
        # and are sliced off below.
        yp = jnp.pad(yp, ((0, 0), (0, bs_p - bs), (0, F_p - F)))
        yt = jnp.pad(yt, ((0, bs_p - bs), (0, F_p - F)))

    kernel = functools.partial(
        _pp_loss_kernel,
        n_adjs=A,
        comparators=_median_selection_network(A),
        inv_feat=1.0 / F)

    # Rough per-step VMEM footprint; only matters once tiles get big.
    block_bytes = 4 * (A * tb * ft + 3 * tb * ft + 2 * tb)
    vmem_limit = max(32 * 1024 * 1024, min(6 * block_bytes, 64 * 1024 * 1024))

    ae, se, sf = pl.pallas_call(
        kernel,
        grid=(nb, nf),
        in_specs=[
            pl.BlockSpec(memory_space=pltpu.MemorySpace.SMEM),         # wc (A+1,)
            pl.BlockSpec((A, tb, ft), lambda b, f: (0, b, f)),         # y_pred
            pl.BlockSpec((tb, ft), lambda b, f: (b, f)),               # y_true
        ],
        out_specs=[
            pl.BlockSpec((tb, ft), lambda b, f: (b, f)),               # pp_ae
            pl.BlockSpec((tb, 1), lambda b, f: (b, 0)),                # pp_se
            pl.BlockSpec((tb, 1), lambda b, f: (b, 0)),                # sf term
        ],
        out_shape=[
            jax.ShapeDtypeStruct((bs_p, F_p), jnp.float32),
            jax.ShapeDtypeStruct((bs_p, 1), jnp.float32),
            jax.ShapeDtypeStruct((bs_p, 1), jnp.float32),
        ],
        compiler_params=pltpu.CompilerParams(
            dimension_semantics=("parallel", "arbitrary"),
            vmem_limit_bytes=vmem_limit),
    )(wc, yp, yt)

    pp_ae = ae[:bs, :F].reshape(bs, n_nodes, out_feat)
    pp_se = se[:bs, 0]
    metrics = {"point_prediction_ae": pp_ae, "point_prediction_se": pp_se}

    if gradient_estimator == "st":
        total_loss = jnp.mean(pp_se)
    elif gradient_estimator == "sf":
        # (sf_loss * diff_).mean() over (bs, F) == mean over bs of per-batch means
        total_loss = jnp.mean(sf[:bs, 0]) + jnp.mean(pp_se)
    else:
        raise ValueError(f"unknown gradient_estimator: {gradient_estimator}")
    return total_loss, metrics


# ----------------------------------------------------------------------------
# Demo / correctness check
# ----------------------------------------------------------------------------
def _reference(y_pred, y_true, log_likelihoods, gradient_estimator, variance_reduction):
    bs, A, n_nodes, out_feat = y_pred.shape
    ll = log_likelihoods.sum(-1)
    med = jnp.quantile(y_pred, 0.5, axis=1)
    ae = jnp.abs(med - y_true)
    se = jnp.mean((y_pred.mean(axis=1) - y_true) ** 2, axis=(-1, -2))
    if gradient_estimator == "st":
        total = se.mean()
    else:
        F = n_nodes * out_feat
        ypf = y_pred.reshape(bs, A, F)
        ytf = y_true.reshape(bs, F)
        diff_ = 2.0 * (ypf.mean(axis=1) - ytf)
        if variance_reduction:
            beta = (ypf.sum(axis=1, keepdims=True) - ypf) / (A - 1)
        else:
            beta = 0.0
        sf_loss = ((ypf - beta) * ll[None, :, None]).mean(axis=1)
        total = (sf_loss * diff_).mean() + se.mean()
    return total, ae, se


if __name__ == "__main__":
    key = jax.random.PRNGKey(0)

    configs = [
        # (bs, n_adjs, n_nodes, out_feat, gradient_estimator, variance_reduction, tile_f)
        (2, 8, 16, 8, "sf", True, None),    # base case, even n_adjs
        (9, 5, 10, 20, "sf", False, 128),   # odd n_adjs, batch padding, F tiling
        (4, 3, 8, 4, "st", True, None),     # 'st' estimator, odd n_adjs
    ]

    for idx, (bs, A, n_nodes, out_feat, ge, vr, tf) in enumerate(configs):
        key, k1, k2, k3 = jax.random.split(key, 4)
        y_pred = jax.random.normal(k1, (bs, A, n_nodes, out_feat), jnp.float32)
        y_true = jax.random.normal(k2, (bs, n_nodes, out_feat), jnp.float32)
        log_likelihoods = jax.random.normal(k3, (A, n_nodes), jnp.float32)

        total, metrics = point_prediction_loss(
            y_pred, y_true, log_likelihoods,
            gradient_estimator=ge, variance_reduction=vr, tile_f=tf)
        jax.block_until_ready((total, metrics))

        ref_total, ref_ae, ref_se = _reference(y_pred, y_true, log_likelihoods, ge, vr)
        assert jnp.allclose(metrics["point_prediction_ae"], ref_ae,
                            atol=1e-5, rtol=1e-5), f"pp_ae mismatch (config {idx})"
        assert jnp.allclose(metrics["point_prediction_se"], ref_se,
                            atol=1e-5, rtol=1e-5), f"pp_se mismatch (config {idx})"
        assert jnp.allclose(total, ref_total,
                            atol=1e-4, rtol=1e-4), f"total_loss mismatch (config {idx})"

    print("KERNEL_OK")
</pallas_src>

<mosaic_0001>
module attributes {stable_mosaic.version = 11 : i64} {
  func.func @_pp_loss_kernel(%arg0: i32, %arg1: i32, %arg2: memref<9xf32, #tpu.memory_space<smem>>, %arg3: memref<8x2x128xf32, #tpu.memory_space<vmem>>, %arg4: memref<2x128xf32, #tpu.memory_space<vmem>>, %arg5: memref<2x128xf32, #tpu.memory_space<vmem>>, %arg6: memref<2x1xf32, #tpu.memory_space<vmem>>, %arg7: memref<2x1xf32, #tpu.memory_space<vmem>>) attributes {dimension_semantics = [#tpu.dimension_semantics<parallel>, #tpu.dimension_semantics<arbitrary>], iteration_bounds = array<i64: 1, 1>, scalar_prefetch = 0 : i64, scratch_operands = 0 : i64, tpu.core_type = #tpu.core_type<tc>, window_params = [{transform_indices = @transform_0, window_bounds = array<i64: 9>}, {transform_indices = @transform_1, window_bounds = array<i64: 8, 2, 128>}, {transform_indices = @transform_2, window_bounds = array<i64: 2, 128>}, {transform_indices = @transform_3, window_bounds = array<i64: 2, 128>}, {transform_indices = @transform_4, window_bounds = array<i64: 2, 1>}, {transform_indices = @transform_5, window_bounds = array<i64: 2, 1>}]} {
    %c0 = arith.constant 0 : index
    %c0_0 = arith.constant 0 : index
    %c0_1 = arith.constant 0 : index
    %0 = vector.load %arg3[%c0, %c0_0, %c0_1] : memref<8x2x128xf32, #tpu.memory_space<vmem>>, vector<8x2x128xf32>
    %c0_2 = arith.constant 0 : index
    %c0_3 = arith.constant 0 : index
    %1 = vector.load %arg4[%c0_2, %c0_3] : memref<2x128xf32, #tpu.memory_space<vmem>>, vector<2x128xf32>
    %2 = vector.extract_strided_slice %0 {offsets = [0, 0, 0], sizes = [1, 2, 128], strides = [1, 1, 1]} : vector<8x2x128xf32> to vector<1x2x128xf32>
    %3 = vector.shape_cast %2 : vector<1x2x128xf32> to vector<2x128xf32>
    %4 = vector.extract_strided_slice %0 {offsets = [1, 0, 0], sizes = [1, 2, 128], strides = [1, 1, 1]} : vector<8x2x128xf32> to vector<1x2x128xf32>
    %5 = vector.shape_cast %4 : vector<1x2x128xf32> to vector<2x128xf32>
    %6 = vector.extract_strided_slice %0 {offsets = [2, 0, 0], sizes = [1, 2, 128], strides = [1, 1, 1]} : vector<8x2x128xf32> to vector<1x2x128xf32>
    %7 = vector.shape_cast %6 : vector<1x2x128xf32> to vector<2x128xf32>
    %8 = vector.extract_strided_slice %0 {offsets = [3, 0, 0], sizes = [1, 2, 128], strides = [1, 1, 1]} : vector<8x2x128xf32> to vector<1x2x128xf32>
    %9 = vector.shape_cast %8 : vector<1x2x128xf32> to vector<2x128xf32>
    %10 = vector.extract_strided_slice %0 {offsets = [4, 0, 0], sizes = [1, 2, 128], strides = [1, 1, 1]} : vector<8x2x128xf32> to vector<1x2x128xf32>
    %11 = vector.shape_cast %10 : vector<1x2x128xf32> to vector<2x128xf32>
    %12 = vector.extract_strided_slice %0 {offsets = [5, 0, 0], sizes = [1, 2, 128], strides = [1, 1, 1]} : vector<8x2x128xf32> to vector<1x2x128xf32>
    %13 = vector.shape_cast %12 : vector<1x2x128xf32> to vector<2x128xf32>
    %14 = vector.extract_strided_slice %0 {offsets = [6, 0, 0], sizes = [1, 2, 128], strides = [1, 1, 1]} : vector<8x2x128xf32> to vector<1x2x128xf32>
    %15 = vector.shape_cast %14 : vector<1x2x128xf32> to vector<2x128xf32>
    %16 = vector.extract_strided_slice %0 {offsets = [7, 0, 0], sizes = [1, 2, 128], strides = [1, 1, 1]} : vector<8x2x128xf32> to vector<1x2x128xf32>
    %17 = vector.shape_cast %16 : vector<1x2x128xf32> to vector<2x128xf32>
    %c0_4 = arith.constant 0 : index
    %18 = memref.load %arg2[%c0_4] : memref<9xf32, #tpu.memory_space<smem>>
    %19 = vector.broadcast %18 : f32 to vector<2x128xf32>
    %20 = arith.mulf %3, %19 : vector<2x128xf32>
    %21 = arith.addf %3, %5 : vector<2x128xf32>
    %c1 = arith.constant 1 : index
    %22 = memref.load %arg2[%c1] : memref<9xf32, #tpu.memory_space<smem>>
    %23 = vector.broadcast %22 : f32 to vector<2x128xf32>
    %24 = arith.mulf %5, %23 : vector<2x128xf32>
    %25 = arith.addf %20, %24 : vector<2x128xf32>
    %26 = arith.addf %21, %7 : vector<2x128xf32>
    %c2 = arith.constant 2 : index
    %27 = memref.load %arg2[%c2] : memref<9xf32, #tpu.memory_space<smem>>
    %28 = vector.broadcast %27 : f32 to vector<2x128xf32>
    %29 = arith.mulf %7, %28 : vector<2x128xf32>
    %30 = arith.addf %25, %29 : vector<2x128xf32>
    %31 = arith.addf %26, %9 : vector<2x128xf32>
    %c3 = arith.constant 3 : index
    %32 = memref.load %arg2[%c3] : memref<9xf32, #tpu.memory_space<smem>>
    %33 = vector.broadcast %32 : f32 to vector<2x128xf32>
    %34 = arith.mulf %9, %33 : vector<2x128xf32>
    %35 = arith.addf %30, %34 : vector<2x128xf32>
    %36 = arith.addf %31, %11 : vector<2x128xf32>
    %c4 = arith.constant 4 : index
    %37 = memref.load %arg2[%c4] : memref<9xf32, #tpu.memory_space<smem>>
    %38 = vector.broadcast %37 : f32 to vector<2x128xf32>
    %39 = arith.mulf %11, %38 : vector<2x128xf32>
    %40 = arith.addf %35, %39 : vector<2x128xf32>
    %41 = arith.addf %36, %13 : vector<2x128xf32>
    %c5 = arith.constant 5 : index
    %42 = memref.load %arg2[%c5] : memref<9xf32, #tpu.memory_space<smem>>
    %43 = vector.broadcast %42 : f32 to vector<2x128xf32>
    %44 = arith.mulf %13, %43 : vector<2x128xf32>
    %45 = arith.addf %40, %44 : vector<2x128xf32>
    %46 = arith.addf %41, %15 : vector<2x128xf32>
    %c6 = arith.constant 6 : index
    %47 = memref.load %arg2[%c6] : memref<9xf32, #tpu.memory_space<smem>>
    %48 = vector.broadcast %47 : f32 to vector<2x128xf32>
    %49 = arith.mulf %15, %48 : vector<2x128xf32>
    %50 = arith.addf %45, %49 : vector<2x128xf32>
    %51 = arith.addf %46, %17 : vector<2x128xf32>
    %c7 = arith.constant 7 : index
    %52 = memref.load %arg2[%c7] : memref<9xf32, #tpu.memory_space<smem>>
    %53 = vector.broadcast %52 : f32 to vector<2x128xf32>
    %54 = arith.mulf %17, %53 : vector<2x128xf32>
    %55 = arith.addf %50, %54 : vector<2x128xf32>
    %56 = arith.minimumf %3, %11 : vector<2x128xf32>
    %57 = arith.maximumf %3, %11 : vector<2x128xf32>
    %58 = arith.minimumf %5, %13 : vector<2x128xf32>
    %59 = arith.maximumf %5, %13 : vector<2x128xf32>
    %60 = arith.minimumf %7, %15 : vector<2x128xf32>
    %61 = arith.maximumf %7, %15 : vector<2x128xf32>
    %62 = arith.minimumf %9, %17 : vector<2x128xf32>
    %63 = arith.maximumf %9, %17 : vector<2x128xf32>
    %64 = arith.minimumf %56, %60 : vector<2x128xf32>
    %65 = arith.maximumf %56, %60 : vector<2x128xf32>
    %66 = arith.minimumf %58, %62 : vector<2x128xf32>
    %67 = arith.maximumf %58, %62 : vector<2x128xf32>
    %68 = arith.minimumf %57, %61 : vector<2x128xf32>
    %69 = arith.maximumf %57, %61 : vector<2x128xf32>
    %70 = arith.minimumf %59, %63 : vector<2x128xf32>
    %71 = arith.maximumf %59, %63 : vector<2x128xf32>
    %72 = arith.minimumf %65, %68 : vector<2x128xf32>
    %73 = arith.maximumf %65, %68 : vector<2x128xf32>
    %74 = arith.minimumf %67, %70 : vector<2x128xf32>
    %75 = arith.maximumf %67, %70 : vector<2x128xf32>
    %76 = arith.maximumf %64, %66 : vector<2x128xf32>
    %77 = arith.maximumf %72, %74 : vector<2x128xf32>
    %78 = arith.minimumf %73, %75 : vector<2x128xf32>
    %79 = arith.minimumf %69, %71 : vector<2x128xf32>
    %80 = arith.maximumf %76, %78 : vector<2x128xf32>
    %81 = arith.minimumf %77, %79 : vector<2x128xf32>
    %82 = arith.minimumf %81, %80 : vector<2x128xf32>
    %83 = arith.maximumf %81, %80 : vector<2x128xf32>
    %84 = arith.addf %82, %83 : vector<2x128xf32>
    %cst = arith.constant 5.000000e-01 : f32
    %85 = vector.broadcast %cst : f32 to vector<2x128xf32>
    %86 = arith.mulf %85, %84 : vector<2x128xf32>
    %87 = arith.subf %86, %1 : vector<2x128xf32>
    %88 = math.absf %87 : vector<2x128xf32>
    %c0_5 = arith.constant 0 : index
    %c0_6 = arith.constant 0 : index
    %89 = vector.load %arg5[%c0_5, %c0_6] : memref<2x128xf32, #tpu.memory_space<vmem>>, vector<2x128xf32>
    tpu.vector_store %arg5[%c0_5, %c0_6], %88 {strides = array<i32>} : memref<2x128xf32, #tpu.memory_space<vmem>>, vector<2x128xf32>,
    %cst_7 = arith.constant 1.250000e-01 : f32
    %90 = vector.broadcast %cst_7 : f32 to vector<2x128xf32>
    %91 = arith.mulf %51, %90 : vector<2x128xf32>
    %92 = arith.subf %91, %1 : vector<2x128xf32>
    %c8 = arith.constant 8 : index
    %93 = memref.load %arg2[%c8] : memref<9xf32, #tpu.memory_space<smem>>
    %94 = vector.broadcast %93 : f32 to vector<2x128xf32>
    %95 = arith.mulf %51, %94 : vector<2x128xf32>
    %96 = arith.subf %55, %95 : vector<2x128xf32>
    %97 = arith.mulf %92, %92 : vector<2x128xf32>
    %cst_8 = arith.constant dense<0.000000e+00> : vector<2xf32>
    %98 = vector.multi_reduction <add>, %97, %cst_8 [1] : vector<2x128xf32> to vector<2xf32>
    %99 = vector.shape_cast %98 : vector<2xf32> to vector<2x1xf32>
    %cst_9 = arith.constant 7.812500e-03 : f32
    %100 = vector.broadcast %cst_9 : f32 to vector<2x1xf32>
    %101 = arith.mulf %99, %100 : vector<2x1xf32>
    %cst_10 = arith.constant 2.000000e+00 : f32
    %102 = vector.broadcast %cst_10 : f32 to vector<2x128xf32>
    %103 = arith.mulf %102, %92 : vector<2x128xf32>
    %104 = arith.mulf %96, %103 : vector<2x128xf32>
    %cst_11 = arith.constant dense<0.000000e+00> : vector<2xf32>
    %105 = vector.multi_reduction <add>, %104, %cst_11 [1] : vector<2x128xf32> to vector<2xf32>
    %106 = vector.shape_cast %105 : vector<2xf32> to vector<2x1xf32>
    %cst_12 = arith.constant 7.812500e-03 : f32
    %107 = vector.broadcast %cst_12 : f32 to vector<2x1xf32>
    %108 = arith.mulf %106, %107 : vector<2x1xf32>
    %c0_i32 = arith.constant 0 : i32
    %109 = arith.cmpi eq, %arg1, %c0_i32 : i32
    %110 = arith.extui %109 : i1 to i32
    %c0_i32_13 = arith.constant 0 : i32
    %111 = arith.cmpi ne, %110, %c0_i32_13 : i32
    scf.if %111 {
      %cst_22 = arith.constant 0.000000e+00 : f32
      %118 = vector.broadcast %cst_22 : f32 to vector<2x1xf32>
      %c0_23 = arith.constant 0 : index
      %c0_24 = arith.constant 0 : index
      %119 = vector.load %arg6[%c0_23, %c0_24] : memref<2x1xf32, #tpu.memory_space<vmem>>, vector<2x1xf32>
      tpu.vector_store %arg6[%c0_23, %c0_24], %118 {strides = array<i32>} : memref<2x1xf32, #tpu.memory_space<vmem>>, vector<2x1xf32>,
      %cst_25 = arith.constant 0.000000e+00 : f32
      %120 = vector.broadcast %cst_25 : f32 to vector<2x1xf32>
      %c0_26 = arith.constant 0 : index
      %c0_27 = arith.constant 0 : index
      %121 = vector.load %arg7[%c0_26, %c0_27] : memref<2x1xf32, #tpu.memory_space<vmem>>, vector<2x1xf32>
      tpu.vector_store %arg7[%c0_26, %c0_27], %120 {strides = array<i32>} : memref<2x1xf32, #tpu.memory_space<vmem>>, vector<2x1xf32>,
    } else {
    }
    %c0_14 = arith.constant 0 : index
    %c0_15 = arith.constant 0 : index
    %112 = vector.load %arg6[%c0_14, %c0_15] : memref<2x1xf32, #tpu.memory_space<vmem>>, vector<2x1xf32>
    %113 = arith.addf %112, %101 : vector<2x1xf32>
    %c0_16 = arith.constant 0 : index
    %c0_17 = arith.constant 0 : index
    %114 = vector.load %arg6[%c0_16, %c0_17] : memref<2x1xf32, #tpu.memory_space<vmem>>, vector<2x1xf32>
    tpu.vector_store %arg6[%c0_16, %c0_17], %113 {strides = array<i32>} : memref<2x1xf32, #tpu.memory_space<vmem>>, vector<2x1xf32>,
    %c0_18 = arith.constant 0 : index
    %c0_19 = arith.constant 0 : index
    %115 = vector.load %arg7[%c0_18, %c0_19] : memref<2x1xf32, #tpu.memory_space<vmem>>, vector<2x1xf32>
    %116 = arith.addf %115, %108 : vector<2x1xf32>
    %c0_20 = arith.constant 0 : index
    %c0_21 = arith.constant 0 : index
    %117 = vector.load %arg7[%c0_20, %c0_21] : memref<2x1xf32, #tpu.memory_space<vmem>>, vector<2x1xf32>
    tpu.vector_store %arg7[%c0_20, %c0_21], %116 {strides = array<i32>} : memref<2x1xf32, #tpu.memory_space<vmem>>, vector<2x1xf32>,
    return
  }
  func.func @transform_0(%arg0: i32, %arg1: i32) -> i32 {
    %c0_i32 = arith.constant 0 : i32
    %c0_i32_0 = arith.constant 0 : i32
    return %c0_i32 : i32
  }
  func.func @transform_1(%arg0: i32, %arg1: i32) -> (i32, i32, i32) {
    %c0_i32 = arith.constant 0 : i32
    %c0_i32_0 = arith.constant 0 : i32
    return %c0_i32, %arg0, %arg1 : i32, i32, i32
  }
  func.func @transform_2(%arg0: i32, %arg1: i32) -> (i32, i32) {
    %c0_i32 = arith.constant 0 : i32
    return %arg0, %arg1 : i32, i32
  }
  func.func @transform_3(%arg0: i32, %arg1: i32) -> (i32, i32) {
    %c0_i32 = arith.constant 0 : i32
    return %arg0, %arg1 : i32, i32
  }
  func.func @transform_4(%arg0: i32, %arg1: i32) -> (i32, i32) {
    %c0_i32 = arith.constant 0 : i32
    %c0_i32_0 = arith.constant 0 : i32
    return %arg0, %c0_i32 : i32, i32
  }
  func.func @transform_5(%arg0: i32, %arg1: i32) -> (i32, i32) {
    %c0_i32 = arith.constant 0 : i32
    %c0_i32_0 = arith.constant 0 : i32
    return %arg0, %c0_i32 : i32, i32
  }
}

</mosaic_0001>

<bundles_post_ra>
// kernel: tpu_custom_call.1
= control target key start
LH: loop header
LB: loop body
LE: loop exit
PB: predicated region body
PF: predicated region fallthrough
CT: control target
= control target key end

     0   :  { %11 = vsyncpa [#allocation5], 0  ;;  %s379_s0 = inlined_call_operand.hbm [shape: f32[9], index: 0, kind: input, shape index: {}]   ;;  %s380_s1 = inlined_call_operand.hbm [shape: f32[8,2,128], index: 1, kind: input, shape index: {}]   ;;  %s381_s2 = inlined_call_operand.vmem [shape: f32[2,128], index: 2, kind: input, shape index: {}]   ;;  %s382_s3 = inlined_call_operand.hbm [shape: f32[2,128], index: 3, kind: output, shape index: {0}]   ;;  %s383_s4 = inlined_call_operand.vmem [shape: f32[2,1], index: 4, kind: output, shape index: {1}]   ;;  %s384_s5 = inlined_call_operand.vmem [shape: f32[2,1], index: 5, kind: output, shape index: {2}]  }
   0x1   :  { %12 = vsyncpa [#allocation3], 0 }
   0x2   :  { %13 = vsyncpa [#allocation4], 0  ;;  %s193_s20 = scalar_lea.hbm %s379_s0, 16 }
   0x3   :  { %p194_p0 = scmp.ne.s32.totalorder %s379_s0, %s193_s20  ;;  %p197_p1 = scmp.lt.u32.totalorder %s193_s20, %s379_s0 }
   0x5   :  { %p199_p2 = pnand %p197_p1, %p194_p0 }
   0x7   :  { %202 = shalt.err (!%p199_p2)
}
   0x8   :  { %s253_s25 = smov [#allocation2]   ;;  %s254_s28 = smov [#allocation6]  }
   0x9   :  { %21 = dma.hbm_to_smem %s379_s0, 16, %s253_s25, [#allocation5]  }
   0xa   :  { %s27_s29 = sshll.u32 %s254_s28, 4  ;;  %s203_s7 = scalar_lea.hbm %s380_s1, 256  ;;  %s28_s29 = int_to_ptr.vmem [resolvable:$true] %s27_s29 }
   0xb   :  { %p204_p3 = scmp.ne.s32.totalorder %s380_s1, %s203_s7  ;;  %p207_p4 = scmp.lt.u32.totalorder %s203_s7, %s380_s1 }
   0xd   :  { %p209_p5 = pnand %p207_p4, %p204_p3 }
   0xf   :  { %212 = shalt.err (!%p209_p5)
}
  0x10   :  { %s213_s12 = scalar_lea.vmem %s28_s29, 256  ;;  %p218_p7 = scmp.lt.s32.totalorder %s28_s29, %s28_s29 }
  0x11   :  { %p214_p6 = scmp.ne.s32.totalorder %s28_s29, %s213_s12  ;;  %p219_p8 = scmp.lt.s32.totalorder %s213_s12, %s213_s12 }
  0x13   :  { %p220_p9 = por %p219_p8, %p218_p7 }
  0x15   :  { %p221_p10 = pnand %p220_p9, %p214_p6 }
  0x17   :  { %224 = shalt.err (!%p221_p10)
}
  0x18   :  { %s255_s0 = smov 32   ;;  %s256_s13 = smov 2  }
  0x19   :  { %33 = dma.hbm_to_vmem [thread:$0]  %s380_s1, 256, %s28_s29, [#allocation3], %s255_s0, %s255_s0, %s256_s13  }
  0x1a   :  { %247 = dma.done.wait [#allocation5], 16  }
  0x1b   :  { %248 = vsyncadd [#allocation5], 4294967280 }
  0x1c   :  { %249 = dma.done.wait [#allocation3], 256  }
  0x1d   :  { %250 = vsyncadd [#allocation3], 4294967040 }
  0x1e   :  { %42 = sfence }
  0x1f   :  { %v313_v0 = vld [vmem:[#allocation6] sm:$0x3]  ;;  %v315_v1 = vld [vmem:[#allocation6 + $0x2] sm:$0x3]  ;;  %v317_v2 = vld [vmem:[#allocation6 + $0x4] sm:$0x3] }
  0x20   :  { %v55_v3 = vadd.f32 %v315_v1, %v313_v0  ;;  %v321_v4 = vld [vmem:[#allocation6 + $0x6] sm:$0x3]  ;;  %v47_v5 = vld [vmem:[#allocation6 + $0x8] sm:$0x3]  ;;  %s52_s1 = sld [smem:[#allocation2]]  ;;  %s179_s16 = sld [smem:[#allocation2 + $0x1]] }
  0x21   :  { %vm145_vm0 = vcmask 1024   ;;  %s180_s17 = sld [smem:[#allocation2 + $0x2]]  ;;  %s181_s18 = sld [smem:[#allocation2 + $0x3]]  ;;  %v257_v8 = vmov 0.0   ;;  %v48_v9 = vld [vmem:[#allocation6 + $0xa] sm:$0x3]  ;;  %v90_v49 = vmin.f32 %v313_v0, %v47_v5  ;;  %v91_v50 = vmax.f32 %v313_v0, %v47_v5 }
  0x22   :  { %v60_v6 = vadd.f32 %v55_v3, %v317_v2  ;;  %s182_s19 = sld [smem:[#allocation2 + $0x4]]  ;;  %s325_s20 = sld [smem:[#allocation2 + $0x5]]  ;;  %146 = vst.msk [vmem:[%s383_s4] sm:$0x3] %vm145_vm0, %v257_v8  ;;  %147 = vst.msk [vmem:[%s384_s5] sm:$0x3] %vm145_vm0, %v257_v8  ;;  %v92_v51 = vmin.f32 %v315_v1, %v48_v9  ;;  %v93_v52 = vmax.f32 %v315_v1, %v48_v9 }
  0x23   :  { %s184_s25 = sld [smem:[#allocation2 + $0x6]]  ;;  %v49_v11 = vld [vmem:[#allocation6 + $0xc] sm:$0x3]  ;;  %s185_s26 = sld [smem:[#allocation2 + $0x7]]  ;;  %v50_v15 = vld [vmem:[#allocation6 + $0xe] sm:$0x3] }
  0x24   :  { %v65_v7 = vadd.f32 %v60_v6, %v321_v4  ;;  %s186_s27 = sld [smem:[#allocation2 + $0x8]]  ;;  %v51_v27 = vld [vmem:[%s381_s2] sm:$0x3]  ;;  %vm130_vm1 = vcmask 1041408   ;;  %v94_v53 = vmin.f32 %v317_v2, %v49_v11  ;;  %v95_v54 = vmax.f32 %v317_v2, %v49_v11  ;;  %s258_s2 = smov [#allocation7]  }
  0x25   :  { %v96_v55 = vmin.f32 %v321_v4, %v50_v15  ;;  %v97_v57 = vmax.f32 %v321_v4, %v50_v15  ;;  %s161_s30 = sshll.u32 %s258_s2, 4  ;;  %s162_s30 = int_to_ptr.vmem [resolvable:$true] %s161_s30 }
  0x26   :  { %v70_v10 = vadd.f32 %v65_v7, %v47_v5  ;;  %v53_v13 = vstv %s52_s1  ;;  %v57_v14 = vstv %s179_s16  ;;  %v99_v58 = vmax.f32 %v90_v49, %v94_v53  ;;  %s225_s6 = scalar_lea.vmem %s162_s30, 32  ;;  %p230_p12 = scmp.lt.s32.totalorder %s162_s30, %s162_s30 }
  0x27   :  { %v54_v16 = vmul.f32 %v53_v13, %v313_v0  ;;  %v58_v17 = vmul.f32 %v57_v14, %v315_v1  ;;  %v62_v18 = vstv %s180_s17  ;;  %v67_v19 = vstv %s181_s18  ;;  %p226_p11 = scmp.ne.s32.totalorder %s162_s30, %s225_s6  ;;  %p231_p13 = scmp.lt.s32.totalorder %s225_s6, %s225_s6 }
  0x28   :  { %v75_v12 = vadd.f32 %v70_v10, %v48_v9  ;;  %v63_v21 = vmul.f32 %v62_v18, %v317_v2  ;;  %v72_v22 = vstv %s182_s19  ;;  %v68_v24 = vmul.f32 %v67_v19, %v321_v4 }
  0x29   :  { %v59_v23 = vadd.f32 %v58_v17, %v54_v16  ;;  %v77_v26 = vstv %s325_s20  ;;  %v73_v29 = vmul.f32 %v72_v22, %v47_v5  ;;  %v82_v31 = vstv %s184_s25  ;;  %p232_p0 = por %p231_p13, %p230_p12 }
  0x2a   :  { %v80_v20 = vadd.f32 %v75_v12, %v49_v11  ;;  %v78_v33 = vmul.f32 %v77_v26, %v48_v9  ;;  %v87_v35 = vstv %s185_s26  ;;  %v83_v37 = vmul.f32 %v82_v31, %v49_v11 }
  0x2b   :  { %v64_v28 = vadd.f32 %v63_v21, %v59_v23  ;;  %v126_v39 = vstv %s186_s27  ;;  %v88_v41 = vmul.f32 %v87_v35, %v50_v15  ;;  %v101_v59 = vmax.f32 %v92_v51, %v96_v55  ;;  %p233_p1 = pnand %p232_p0, %p226_p11 }
  0x2c   :  { %v85_v25 = vadd.f32 %v80_v20, %v50_v15  ;;  %v102_v60 = vmin.f32 %v91_v50, %v95_v54  ;;  %v98_v61 = vmin.f32 %v90_v49, %v94_v53  ;;  %v100_v62 = vmin.f32 %v92_v51, %v96_v55 }
  0x2d   :  { %v69_v32 = vadd.f32 %v68_v24, %v64_v28  ;;  %v103_v63 = vmax.f32 %v91_v50, %v95_v54  ;;  %v104_v0 = vmin.f32 %v93_v52, %v97_v57  ;;  %v105_v3 = vmax.f32 %v93_v52, %v97_v57 }
  0x2e   :  { %v123_v30 = vmul.f32 0.125, %v85_v25  ;;  %v127_v44 = vmul.f32 %v126_v39, %v85_v25  ;;  %v106_v1 = vmin.f32 %v99_v58, %v102_v60  ;;  %v107_v5 = vmax.f32 %v99_v58, %v102_v60 }
  0x2f   :  { %v74_v36 = vadd.f32 %v73_v29, %v69_v32  ;;  %v108_v6 = vmin.f32 %v101_v59, %v104_v0  ;;  %v109_v7 = vmax.f32 %v101_v59, %v104_v0  ;;  %v110_v2 = vmax.f32 %v98_v61, %v100_v62 }
  0x30   :  { %v124_v34 = vsub.f32 %v123_v30, %v51_v27  ;;  %v113_v8 = vmin.f32 %v103_v63, %v105_v3 }
  0x31   :  { %v79_v40 = vadd.f32 %v78_v33, %v74_v36  ;;  %v111_v9 = vmax.f32 %v106_v1, %v108_v6  ;;  %v112_v10 = vmin.f32 %v107_v5, %v109_v7 }
  0x32   :  { %v129_v38 = vmul.f32 %v124_v34, %v124_v34  ;;  %v135_v46 = vmul.f32 2.0, %v124_v34 }
  0x33   :  { %v84_v43 = vadd.f32 %v83_v37, %v79_v40  ;;  %v114_v11 = vmax.f32 %v110_v2, %v112_v10  ;;  %v115_v12 = vmin.f32 %v111_v9, %v113_v8 }
  0x34   :  { %v131_v42 = vsel %vm130_vm1, %v129_v38, 0.0 }
  0x35   :  { %132 = vadd.xlane.f32.xlu0 %v131_v42  ;;  %v89_v45 = vadd.f32 %v88_v41, %v84_v43  ;;  %v116_v4 = vmin.f32 %v115_v12, %v114_v11  ;;  %v117_v13 = vmax.f32 %v115_v12, %v114_v11 }
  0x37   :  { %v128_v47 = vsub.f32 %v89_v45, %v127_v44  ;;  %v118_v14 = vadd.f32 %v117_v13, %v116_v4 }
  0x39   :  { %v136_v48 = vmul.f32 %v135_v46, %v128_v47  ;;  %v119_v15 = vmul.f32 0.5, %v118_v14 }
  0x3b   :  { %v137_v56 = vsel %vm130_vm1, %v136_v48, 0.0  ;;  %v120_v16 = vsub.f32 %v119_v15, %v51_v27 }
  0x3c   :  { %138 = vadd.xlane.f32.xlu0 %v137_v56 }
  0x3d   :  { %v121_v17 = vand.u32 2147483647, %v120_v16 }
  0x3f   :  { %122 = vst [vmem:[#allocation7] sm:$0x3] %v121_v17 }
  0x40   :  { %236 = shalt.err (!%p233_p1)
}
  0x41   :  { %s237_s9 = scalar_lea.hbm %s382_s3, 32 }
  0x42   :  { %p238_p2 = scmp.ne.s32.totalorder %s382_s3, %s237_s9  ;;  %p241_p3 = scmp.lt.u32.totalorder %s237_s9, %s382_s3 }
  0x44   :  { %p243_p4 = pnand %p241_p3, %p238_p2 }
  0x46   :  { %246 = shalt.err (!%p243_p4)
}
  0x47   :  { %164 = dma.vmem_to_hbm [thread:$0]  %s162_s30, 32, %s382_s3, [#allocation4]   ;;  %v148_v18 = vld [vmem:[%s383_s4] sm:$0x3] }
  0x48   :  { %v152_v22 = vld [vmem:[%s384_s5] sm:$0x3] }
  0xc2   :  { %v133_v19 = vpop.xlane.xlu0 %132 }
  0xc3   :  { %v134_v20 = vmul.f32 0.0078125, %v133_v19 }
  0xc5   :  { %v149_v21 = vadd.f32 %v148_v18, %v134_v20 }
  0xc7   :  { %151 = vst.msk [vmem:[%s383_s4] sm:$0x3] %vm145_vm0, %v149_v21 }
  0xc9   :  { %v139_v23 = vpop.xlane.xlu0 %138 }
  0xca   :  { %v140_v24 = vmul.f32 0.0078125, %v139_v23 }
  0xcc   :  { %v153_v25 = vadd.f32 %v152_v22, %v140_v24 }
  0xce   :  { %154 = vst.msk [vmem:[%s384_s5] sm:$0x3] %vm145_vm0, %v153_v25 }
  0xcf   :  { %251 = dma.done.wait [#allocation4], 32  }
  0xd0   :  { %252 = vsyncadd [#allocation4], 4294967264 }
  0xd1   :  { %176 = vsyncpa [#allocation3], 1 }
  0xd2   :  { %177 = vsyncpa [#allocation4], 1 }
  0xd3   :  { %178 = vsyncpa [#allocation5], 1 }

</bundles_post_ra>
